<compile_context>
chip_gen: v5e
topology: v5e:2x2
jax: 0.10.0
libtpu: 0.0.40
codegen_flags: <defaults>
</compile_context>

<pallas_src>
import functools

import jax
import jax.numpy as jnp
from jax.experimental import pallas as pl
from jax.experimental.pallas import tpu as pltpu

LANE = 128
SUBLANE = 8


def _round_up(n, m):
    return ((n + m - 1) // m) * m


def _pad2d(a, rows, cols):
    r, c = a.shape
    return jnp.pad(a, ((0, rows - r), (0, cols - c)))


# ----------------------------- fused Pallas kernel --------------------------

def fused_simple_rnn_kernel(n_layers, seq_len, width, x_ref, w_ref, v_ref,
                            out_ref):
    """All RNNunit layers + the logistic head in one kernel.

    x_ref  : (T, W) f32  lane-padded input sequence.
    w_ref  : ((2*L + 1) * W, W) bf16  -- per layer [Wx; Wh], then W_log,
             each block zero-padded to (W, W).
    v_ref  : ((2*L + 1) * 8, W) f32   -- per layer [bh; h0], then b_log,
             each stored in row 0 of an 8-row (sublane-aligned) block.
    out_ref: (T, W) f32 logits (first K lanes real).
    """
    act = x_ref[...]                                        # (T, W) f32, vregs

    for l in range(n_layers):
        # Static, sublane-aligned slices of the packed parameter slabs.
        # Weights are (re)loaded per layer (not hoisted across layers) so vreg
        # pressure stays bounded if the stack grows.
        wx = w_ref[pl.ds(2 * l * width, width), :]          # (W, W) bf16
        wh = w_ref[pl.ds((2 * l + 1) * width, width), :]    # (W, W) bf16
        bh = v_ref[pl.ds(2 * l * SUBLANE, 1), :]            # (1, W) f32
        h0 = v_ref[pl.ds((2 * l + 1) * SUBLANE, 1), :]      # (1, W) f32

        # Project all timesteps at once on the MXU and fold in the bias once
        # (both off the serial dependency chain).
        xw = jnp.dot(act.astype(jnp.bfloat16), wx,
                     preferred_element_type=jnp.float32)    # (T, W) f32
        xwb = xw + bh

        # Statically unrolled serial recurrence: hidden stays in vregs,
        # Wh/bias are hoisted above the loop.
        hidden = h0
        rows = []
        for t in range(seq_len):
            hw = jnp.dot(hidden.astype(jnp.bfloat16), wh,
                         preferred_element_type=jnp.float32)
            hidden = jnp.maximum(xwb[t:t + 1, :] + hw, 0.0)  # relu, f32
            rows.append(hidden)
        act = jnp.concatenate(rows, axis=0)                  # (T, W) f32

    # Logistic head (raw logits, matching the PyTorch forward: no sigmoid) and
    # a single lane-dense, unmasked output store.
    wlog = w_ref[pl.ds(2 * n_layers * width, width), :]      # (W, W) bf16
    blog = v_ref[pl.ds(2 * n_layers * SUBLANE, 1), :]        # (1, W) f32
    out_ref[...] = (
        jnp.dot(act.astype(jnp.bfloat16), wlog,
                preferred_element_type=jnp.float32) + blog)


# ------------------------------ JAX wrapper ---------------------------------

def pack_params(params):
    """Pre-pad, pre-cast and pack every parameter ONCE (call outside jit)."""
    units = params["rnn_units"]
    dims = [units[0]["Wx"].shape[0]]
    dims += [u["Wx"].shape[1] for u in units]
    dims.append(params["logistic_W"].shape[1])
    width = _round_up(max(dims), LANE)

    w_blocks, v_blocks = [], []
    for u in units:
        w_blocks += [_pad2d(u["Wx"], width, width),
                     _pad2d(u["Wh"], width, width)]
        v_blocks += [_pad2d(u["bh"], SUBLANE, width),
                     _pad2d(u["h0"], SUBLANE, width)]
    w_blocks.append(_pad2d(params["logistic_W"], width, width))
    v_blocks.append(_pad2d(params["logistic_b"], SUBLANE, width))

    w_packed = jnp.concatenate(w_blocks, axis=0).astype(jnp.bfloat16)
    v_packed = jnp.concatenate(v_blocks, axis=0).astype(jnp.float32)
    return w_packed, v_packed


def simple_rnn_forward(x, w_packed, v_packed, *, out_dim):
    """SimpleRNN.forward: RNNunit stack followed by the logistic Linear."""
    seq_len, _ = x.shape
    width = w_packed.shape[1]
    n_layers = (w_packed.shape[0] // width - 1) // 2
    x_pad = _pad2d(x.astype(jnp.float32), seq_len, width)

    vmem = pl.BlockSpec(memory_space=pltpu.MemorySpace.VMEM)
    out_pad = pl.pallas_call(
        functools.partial(fused_simple_rnn_kernel, n_layers, seq_len, width),
        out_shape=jax.ShapeDtypeStruct((seq_len, width), jnp.float32),
        in_specs=[vmem, vmem, vmem],
        out_specs=vmem,
    )(x_pad, w_packed, v_packed)
    return out_pad[:, :out_dim]


# --------------------------- parameter construction -------------------------

def init_params(key, D, nodes, K):
    params = {"rnn_units": []}
    M1 = D
    for M2 in nodes:
        key, k1, k2 = jax.random.split(key, 3)
        scale = 1.0 / jnp.sqrt(jnp.float32(M1 + M2))
        params["rnn_units"].append({
            "Wx": jax.random.normal(k1, (M1, M2), jnp.float32) * scale,
            "Wh": jax.random.normal(k2, (M2, M2), jnp.float32) * scale,
            "bh": jnp.zeros((1, M2), jnp.float32),
            "h0": jnp.zeros((1, M2), jnp.float32),
        })
        M1 = M2
    # nn.Linear(M1, K): weight (K, M1) ~ U(-1/sqrt(M1), 1/sqrt(M1)); stored
    # here pre-transposed as (M1, K) for the kernel; bias same init.
    key, k1, k2 = jax.random.split(key, 3)
    bound = 1.0 / jnp.sqrt(jnp.float32(M1))
    params["logistic_W"] = jax.random.uniform(
        k1, (M1, K), jnp.float32, -bound, bound)
    params["logistic_b"] = jax.random.uniform(
        k2, (1, K), jnp.float32, -bound, bound)
    return params


# -------------------------------- reference ---------------------------------

def simple_rnn_reference(x, params):
    for p in params["rnn_units"]:
        xw = x @ p["Wx"]
        hidden = p["h0"]
        rows = []
        for t in range(x.shape[0]):
            hidden = jax.nn.relu(xw[t:t + 1] + hidden @ p["Wh"] + p["bh"])
            rows.append(hidden)
        x = jnp.concatenate(rows, axis=0)
    return x @ params["logistic_W"] + params["logistic_b"]


# ---------------------------------- main -------------------------------------

if __name__ == "__main__":
    T, D = 8, 4          # sequence length, input feature dim
    nodes = (32,)        # hidden sizes of the RNNunit stack
    K = 2                # output classes (parity)

    key = jax.random.PRNGKey(0)
    key, kx, kp = jax.random.split(key, 3)
    x = jax.random.normal(kx, (T, D), jnp.float32)
    params = init_params(kp, D, nodes, K)

    # One-time parameter packing (pad + bf16 cast + contiguous slabs).
    w_packed, v_packed = pack_params(params)

    forward = jax.jit(functools.partial(simple_rnn_forward, out_dim=K))
    out = forward(x, w_packed, v_packed)
    out = jax.block_until_ready(out)

    ref = simple_rnn_reference(x, params)
    assert out.shape == (T, K)
    # Tolerance relaxed vs. pure f32: MXU operands are bf16 (f32 accumulate).
    assert jnp.allclose(out, ref, atol=5e-2, rtol=5e-2), (
        f"mismatch: max abs err = {jnp.max(jnp.abs(out - ref))}")

    print("KERNEL_OK")
</pallas_src>

<mosaic_0001>
module attributes {stable_mosaic.version = 11 : i64} {
  func.func @fused_simple_rnn_kernel(%arg0: memref<8x128xf32, #tpu.memory_space<vmem>>, %arg1: memref<384x128xbf16, #tpu.memory_space<vmem>>, %arg2: memref<24x128xf32, #tpu.memory_space<vmem>>, %arg3: memref<8x128xf32, #tpu.memory_space<vmem>>) attributes {dimension_semantics = [], scalar_prefetch = 0 : i64, scratch_operands = 0 : i64, tpu.core_type = #tpu.core_type<tc>} {
    %c0 = arith.constant 0 : index
    %c0_0 = arith.constant 0 : index
    %0 = vector.load %arg0[%c0, %c0_0] : memref<8x128xf32, #tpu.memory_space<vmem>>, vector<8x128xf32>
    %c0_1 = arith.constant 0 : index
    %c0_2 = arith.constant 0 : index
    %1 = vector.load %arg1[%c0_1, %c0_2] : memref<384x128xbf16, #tpu.memory_space<vmem>>, vector<128x128xbf16>
    %c128 = arith.constant 128 : index
    %c0_3 = arith.constant 0 : index
    %2 = vector.load %arg1[%c128, %c0_3] : memref<384x128xbf16, #tpu.memory_space<vmem>>, vector<128x128xbf16>
    %c0_4 = arith.constant 0 : index
    %c0_5 = arith.constant 0 : index
    %3 = vector.load %arg2[%c0_4, %c0_5] : memref<24x128xf32, #tpu.memory_space<vmem>>, vector<1x128xf32>
    %c8 = arith.constant 8 : index
    %c0_6 = arith.constant 0 : index
    %4 = vector.load %arg2[%c8, %c0_6] : memref<24x128xf32, #tpu.memory_space<vmem>>, vector<1x128xf32>
    %5 = arith.truncf %0 : vector<8x128xf32> to vector<8x128xbf16>
    %cst = arith.constant dense<0.000000e+00> : vector<8x128xf32>
    %6 = tpu.matmul %5, %1, %cst {dimension_numbers = #tpu.dot_dimension_numbers<[1], [0], [0], [1], [0, 0, 1, 1], [], []>} : vector<8x128xbf16>, vector<128x128xbf16>, vector<8x128xf32> -> vector<8x128xf32>
    %7 = vector.broadcast %3 : vector<1x128xf32> to vector<8x128xf32>
    %8 = arith.addf %6, %7 : vector<8x128xf32>
    %9 = arith.truncf %4 : vector<1x128xf32> to vector<1x128xbf16>
    %cst_7 = arith.constant dense<0.000000e+00> : vector<1x128xf32>
    %10 = tpu.matmul %9, %2, %cst_7 {dimension_numbers = #tpu.dot_dimension_numbers<[1], [0], [0], [1], [0, 0, 1, 1], [], []>} : vector<1x128xbf16>, vector<128x128xbf16>, vector<1x128xf32> -> vector<1x128xf32>
    %11 = vector.extract_strided_slice %8 {offsets = [0, 0], sizes = [1, 128], strides = [1, 1]} : vector<8x128xf32> to vector<1x128xf32>
    %12 = arith.addf %11, %10 : vector<1x128xf32>
    %cst_8 = arith.constant 0.000000e+00 : f32
    %13 = vector.broadcast %cst_8 : f32 to vector<1x128xf32>
    %14 = arith.maximumf %12, %13 : vector<1x128xf32>
    %15 = arith.truncf %14 : vector<1x128xf32> to vector<1x128xbf16>
    %cst_9 = arith.constant dense<0.000000e+00> : vector<1x128xf32>
    %16 = tpu.matmul %15, %2, %cst_9 {dimension_numbers = #tpu.dot_dimension_numbers<[1], [0], [0], [1], [0, 0, 1, 1], [], []>} : vector<1x128xbf16>, vector<128x128xbf16>, vector<1x128xf32> -> vector<1x128xf32>
    %17 = vector.extract_strided_slice %8 {offsets = [1, 0], sizes = [1, 128], strides = [1, 1]} : vector<8x128xf32> to vector<1x128xf32>
    %18 = arith.addf %17, %16 : vector<1x128xf32>
    %cst_10 = arith.constant 0.000000e+00 : f32
    %19 = vector.broadcast %cst_10 : f32 to vector<1x128xf32>
    %20 = arith.maximumf %18, %19 : vector<1x128xf32>
    %21 = arith.truncf %20 : vector<1x128xf32> to vector<1x128xbf16>
    %cst_11 = arith.constant dense<0.000000e+00> : vector<1x128xf32>
    %22 = tpu.matmul %21, %2, %cst_11 {dimension_numbers = #tpu.dot_dimension_numbers<[1], [0], [0], [1], [0, 0, 1, 1], [], []>} : vector<1x128xbf16>, vector<128x128xbf16>, vector<1x128xf32> -> vector<1x128xf32>
    %23 = vector.extract_strided_slice %8 {offsets = [2, 0], sizes = [1, 128], strides = [1, 1]} : vector<8x128xf32> to vector<1x128xf32>
    %24 = arith.addf %23, %22 : vector<1x128xf32>
    %cst_12 = arith.constant 0.000000e+00 : f32
    %25 = vector.broadcast %cst_12 : f32 to vector<1x128xf32>
    %26 = arith.maximumf %24, %25 : vector<1x128xf32>
    %27 = arith.truncf %26 : vector<1x128xf32> to vector<1x128xbf16>
    %cst_13 = arith.constant dense<0.000000e+00> : vector<1x128xf32>
    %28 = tpu.matmul %27, %2, %cst_13 {dimension_numbers = #tpu.dot_dimension_numbers<[1], [0], [0], [1], [0, 0, 1, 1], [], []>} : vector<1x128xbf16>, vector<128x128xbf16>, vector<1x128xf32> -> vector<1x128xf32>
    %29 = vector.extract_strided_slice %8 {offsets = [3, 0], sizes = [1, 128], strides = [1, 1]} : vector<8x128xf32> to vector<1x128xf32>
    %30 = arith.addf %29, %28 : vector<1x128xf32>
    %cst_14 = arith.constant 0.000000e+00 : f32
    %31 = vector.broadcast %cst_14 : f32 to vector<1x128xf32>
    %32 = arith.maximumf %30, %31 : vector<1x128xf32>
    %33 = arith.truncf %32 : vector<1x128xf32> to vector<1x128xbf16>
    %cst_15 = arith.constant dense<0.000000e+00> : vector<1x128xf32>
    %34 = tpu.matmul %33, %2, %cst_15 {dimension_numbers = #tpu.dot_dimension_numbers<[1], [0], [0], [1], [0, 0, 1, 1], [], []>} : vector<1x128xbf16>, vector<128x128xbf16>, vector<1x128xf32> -> vector<1x128xf32>
    %35 = vector.extract_strided_slice %8 {offsets = [4, 0], sizes = [1, 128], strides = [1, 1]} : vector<8x128xf32> to vector<1x128xf32>
    %36 = arith.addf %35, %34 : vector<1x128xf32>
    %cst_16 = arith.constant 0.000000e+00 : f32
    %37 = vector.broadcast %cst_16 : f32 to vector<1x128xf32>
    %38 = arith.maximumf %36, %37 : vector<1x128xf32>
    %39 = arith.truncf %38 : vector<1x128xf32> to vector<1x128xbf16>
    %cst_17 = arith.constant dense<0.000000e+00> : vector<1x128xf32>
    %40 = tpu.matmul %39, %2, %cst_17 {dimension_numbers = #tpu.dot_dimension_numbers<[1], [0], [0], [1], [0, 0, 1, 1], [], []>} : vector<1x128xbf16>, vector<128x128xbf16>, vector<1x128xf32> -> vector<1x128xf32>
    %41 = vector.extract_strided_slice %8 {offsets = [5, 0], sizes = [1, 128], strides = [1, 1]} : vector<8x128xf32> to vector<1x128xf32>
    %42 = arith.addf %41, %40 : vector<1x128xf32>
    %cst_18 = arith.constant 0.000000e+00 : f32
    %43 = vector.broadcast %cst_18 : f32 to vector<1x128xf32>
    %44 = arith.maximumf %42, %43 : vector<1x128xf32>
    %45 = arith.truncf %44 : vector<1x128xf32> to vector<1x128xbf16>
    %cst_19 = arith.constant dense<0.000000e+00> : vector<1x128xf32>
    %46 = tpu.matmul %45, %2, %cst_19 {dimension_numbers = #tpu.dot_dimension_numbers<[1], [0], [0], [1], [0, 0, 1, 1], [], []>} : vector<1x128xbf16>, vector<128x128xbf16>, vector<1x128xf32> -> vector<1x128xf32>
    %47 = vector.extract_strided_slice %8 {offsets = [6, 0], sizes = [1, 128], strides = [1, 1]} : vector<8x128xf32> to vector<1x128xf32>
    %48 = arith.addf %47, %46 : vector<1x128xf32>
    %cst_20 = arith.constant 0.000000e+00 : f32
    %49 = vector.broadcast %cst_20 : f32 to vector<1x128xf32>
    %50 = arith.maximumf %48, %49 : vector<1x128xf32>
    %51 = arith.truncf %50 : vector<1x128xf32> to vector<1x128xbf16>
    %cst_21 = arith.constant dense<0.000000e+00> : vector<1x128xf32>
    %52 = tpu.matmul %51, %2, %cst_21 {dimension_numbers = #tpu.dot_dimension_numbers<[1], [0], [0], [1], [0, 0, 1, 1], [], []>} : vector<1x128xbf16>, vector<128x128xbf16>, vector<1x128xf32> -> vector<1x128xf32>
    %53 = vector.extract_strided_slice %8 {offsets = [7, 0], sizes = [1, 128], strides = [1, 1]} : vector<8x128xf32> to vector<1x128xf32>
    %54 = arith.addf %53, %52 : vector<1x128xf32>
    %cst_22 = arith.constant 0.000000e+00 : f32
    %55 = vector.broadcast %cst_22 : f32 to vector<1x128xf32>
    %56 = arith.maximumf %54, %55 : vector<1x128xf32>
    %57 = tpu.concatenate %14, %20, %26, %32, %38, %44, %50, %56 in 0 : vector<1x128xf32>, vector<1x128xf32>, vector<1x128xf32>, vector<1x128xf32>, vector<1x128xf32>, vector<1x128xf32>, vector<1x128xf32>, vector<1x128xf32> -> vector<8x128xf32>
    %c256 = arith.constant 256 : index
    %c0_23 = arith.constant 0 : index
    %58 = vector.load %arg1[%c256, %c0_23] : memref<384x128xbf16, #tpu.memory_space<vmem>>, vector<128x128xbf16>
    %c16 = arith.constant 16 : index
    %c0_24 = arith.constant 0 : index
    %59 = vector.load %arg2[%c16, %c0_24] : memref<24x128xf32, #tpu.memory_space<vmem>>, vector<1x128xf32>
    %60 = arith.truncf %57 : vector<8x128xf32> to vector<8x128xbf16>
    %cst_25 = arith.constant dense<0.000000e+00> : vector<8x128xf32>
    %61 = tpu.matmul %60, %58, %cst_25 {dimension_numbers = #tpu.dot_dimension_numbers<[1], [0], [0], [1], [0, 0, 1, 1], [], []>} : vector<8x128xbf16>, vector<128x128xbf16>, vector<8x128xf32> -> vector<8x128xf32>
    %62 = vector.broadcast %59 : vector<1x128xf32> to vector<8x128xf32>
    %63 = arith.addf %61, %62 : vector<8x128xf32>
    %c0_26 = arith.constant 0 : index
    %c0_27 = arith.constant 0 : index
    %64 = vector.load %arg3[%c0_26, %c0_27] : memref<8x128xf32, #tpu.memory_space<vmem>>, vector<8x128xf32>
    tpu.vector_store %arg3[%c0_26, %c0_27], %63 {strides = array<i32>} : memref<8x128xf32, #tpu.memory_space<vmem>>, vector<8x128xf32>,
    return
  }
}

</mosaic_0001>

<bundles_post_ra>
// kernel: simple_rnn_forward.1
= control target key start
LH: loop header
LB: loop body
LE: loop exit
PB: predicated region body
PF: predicated region fallthrough
CT: control target
= control target key end

     0   :  { %8 = vsyncpa [#allocation3], 0  ;;  %s599_s15 = smov [#allocation2]   ;;  %s600_s17 = smov 64   ;;  %s700_s0 = inlined_call_operand.vmem [shape: f32[8,128], index: 0, kind: input, shape index: {}]   ;;  %s701_s1 = inlined_call_operand.hbm [shape: bf16[384,128], index: 1, kind: input, shape index: {}]   ;;  %s702_s2 = inlined_call_operand.vmem [shape: f32[24,128], index: 2, kind: input, shape index: {}]   ;;  %s703_s3 = inlined_call_operand.vmem [shape: f32[8,128], index: 3, kind: output, shape index: {}]  }
   0x1   :  { %s15_s14 = sshll.u32 %s701_s1, 4  ;;  %s17_s16 = sshll.u32 %s599_s15, 4  ;;  %s16_s14 = int_to_ptr.hbm [resolvable:$true] %s15_s14  ;;  %s18_s16 = int_to_ptr.vmem [resolvable:$true] %s17_s16 }
   0x2   :  { %s601_s18 = smov 4  }
   0x3   :  { %23 = dma.hbm_to_vmem [thread:$0]  %s16_s14, 3072, %s18_s16, [#allocation3], %s600_s17, %s600_s17, %s601_s18  }
   0x4   :  { %597 = dma.done.wait [#allocation3], 3072  }
   0x5   :  { %598 = vsyncadd [#allocation3], 4294964224  ;;  %v551_v0 = vld [vmem:[#allocation2 + $0x38] sm:$0xff]  ;;  %v550_v2 = vld [vmem:[#allocation2 + $0x30] sm:$0xff]  ;;  %vm348_vm0 = vcmask 1040384   ;;  %vm350_vm1 = vcmask 1041408  }
   0x6   :  { %v625_v1 = vld [vmem:[#allocation2 + $0x78] sm:$0xff]  ;;  %115 = vmatpush.bf16.msra.mxu0 %v551_v0  ;;  %v628_v3 = vld [vmem:[#allocation2 + $0x70] sm:$0xff]  ;;  %v549_v4 = vld [vmem:[#allocation2 + $0x28] sm:$0xff]  ;;  %vm352_vm2 = vcmask 1042432   ;;  %vm354_vm3 = vcmask 1043456   ;;  %vm356_vm4 = vcmask 1044480  }
   0x7   :  { %177 = vmatpush.bf16.msra.mxu1 %v625_v1  ;;  %193 = vmatpush.bf16.msra.mxu2 %v625_v1  ;;  %v633_v5 = vld [vmem:[#allocation2 + $0x68] sm:$0xff]  ;;  %v548_v6 = vld [vmem:[#allocation2 + $0x20] sm:$0xff]  ;;  %v547_v8 = vld [vmem:[#allocation2 + $0x18] sm:$0xff]  ;;  %vm358_vm5 = vcmask 1045504   ;;  %vm360_vm6 = vcmask 1046528  }
   0x8   :  { %216 = vmatpush.bf16.msra.mxu3 %v625_v1  ;;  %v638_v7 = vld [vmem:[#allocation2 + $0x60] sm:$0xff]  ;;  %v643_v9 = vld [vmem:[#allocation2 + $0x58] sm:$0xff]  ;;  %v546_v10 = vld [vmem:[#allocation2 + $0x10] sm:$0xff] }
   0x9   :  { %v554_v11 = vld [vmem:[#allocation2 + $0x50] sm:$0xff]  ;;  %v545_v12 = vld [vmem:[#allocation2 + $0x8] sm:$0xff]  ;;  %v544_v14 = vld [vmem:[#allocation2] sm:$0xff] }
   0xa   :  { %116 = vmatpush.bf16.msra.mxu0 %v550_v2  ;;  %v553_v13 = vld [vmem:[#allocation2 + $0x48] sm:$0xff]  ;;  %v552_v15 = vld [vmem:[#allocation2 + $0x40] sm:$0xff] }
   0xb   :  { %178 = vmatpush.bf16.msra.mxu1 %v628_v3  ;;  %194 = vmatpush.bf16.msra.mxu2 %v628_v3  ;;  %v30_v16 = vld [vmem:[%s700_s0] sm:$0xff]  ;;  %v64_v17 = vld [vmem:[%s702_s2 + $0x8] sm:$0x1] }
   0xc   :  { %217 = vmatpush.bf16.msra.mxu3 %v628_v3  ;;  %v65_v18 = vpack.c.bf16 %v30_v16, %v30_v16  ;;  %v128_v19 = vpack.c.bf16 %v64_v17, %v64_v17  ;;  %v571_v20 = vld [vmem:[%s702_s2] ss:$0 sm:$0xff] }
   0xe   :  { %117 = vmatpush.bf16.msra.mxu0 %v549_v4 }
   0xf   :  { %179 = vmatpush.bf16.msra.mxu1 %v633_v5  ;;  %195 = vmatpush.bf16.msra.mxu2 %v633_v5 }
  0x10   :  { %218 = vmatpush.bf16.msra.mxu3 %v633_v5 }
  0x12   :  { %118 = vmatpush.bf16.msra.mxu0 %v548_v6 }
  0x13   :  { %180 = vmatpush.bf16.msra.mxu1 %v638_v7  ;;  %196 = vmatpush.bf16.msra.mxu2 %v638_v7 }
  0x14   :  { %219 = vmatpush.bf16.msra.mxu3 %v638_v7 }
  0x16   :  { %119 = vmatpush.bf16.msra.mxu0 %v547_v8  ;;  %v566_v8 = vld [vmem:[#allocation2 + $0xb0] sm:$0xff] }
  0x17   :  { %181 = vmatpush.bf16.msra.mxu1 %v643_v9  ;;  %197 = vmatpush.bf16.msra.mxu2 %v643_v9 }
  0x18   :  { %220 = vmatpush.bf16.msra.mxu3 %v643_v9 }
  0x1a   :  { %120 = vmatpush.bf16.msra.mxu0 %v546_v10  ;;  %v564_v10 = vld [vmem:[#allocation2 + $0xa0] sm:$0xff] }
  0x1b   :  { %182 = vmatpush.bf16.msra.mxu1 %v554_v11  ;;  %198 = vmatpush.bf16.msra.mxu2 %v554_v11 }
  0x1c   :  { %221 = vmatpush.bf16.msra.mxu3 %v554_v11 }
  0x1e   :  { %121 = vmatpush.bf16.msra.mxu0 %v545_v12  ;;  %v562_v12 = vld [vmem:[#allocation2 + $0x90] sm:$0xff] }
  0x1f   :  { %183 = vmatpush.bf16.msra.mxu1 %v553_v13  ;;  %199 = vmatpush.bf16.msra.mxu2 %v553_v13 }
  0x20   :  { %222 = vmatpush.bf16.msra.mxu3 %v553_v13 }
  0x22   :  { %122 = vmatpush.bf16.msra.mxu0 %v544_v14 }
  0x23   :  { %184 = vmatpush.bf16.msra.mxu1 %v552_v15  ;;  %200 = vmatpush.bf16.msra.mxu2 %v552_v15 }
  0x24   :  { %223 = vmatpush.bf16.msra.mxu3 %v552_v15 }
  0x25   :  { %123 = vmatmul.bf16.vlgmr.msra.gmra.mxu0 %v65_v18 }
  0x26   :  { %238 = vmatpush.bf16.msrb.mxu0 %v625_v1  ;;  %185 = vmatmul.bf16.vlgmr.msra.gmra.mxu1 %v128_v19 }
  0x27   :  { %262 = vmatpush.bf16.msrb.mxu1 %v625_v1  ;;  %284 = vmatpush.bf16.msrb.mxu2 %v625_v1 }
  0x28   :  { %308 = vmatpush.bf16.msrb.mxu3 %v625_v1 }
  0x2a   :  { %239 = vmatpush.bf16.msrb.mxu0 %v628_v3 }
  0x2b   :  { %263 = vmatpush.bf16.msrb.mxu1 %v628_v3  ;;  %285 = vmatpush.bf16.msrb.mxu2 %v628_v3 }
  0x2c   :  { %309 = vmatpush.bf16.msrb.mxu3 %v628_v3 }
  0x2e   :  { %240 = vmatpush.bf16.msrb.mxu0 %v633_v5 }
  0x2f   :  { %264 = vmatpush.bf16.msrb.mxu1 %v633_v5  ;;  %286 = vmatpush.bf16.msrb.mxu2 %v633_v5 }
  0x30   :  { %310 = vmatpush.bf16.msrb.mxu3 %v633_v5 }
  0x32   :  { %241 = vmatpush.bf16.msrb.mxu0 %v638_v7 }
  0x33   :  { %265 = vmatpush.bf16.msrb.mxu1 %v638_v7  ;;  %287 = vmatpush.bf16.msrb.mxu2 %v638_v7 }
  0x34   :  { %311 = vmatpush.bf16.msrb.mxu3 %v638_v7 }
  0x36   :  { %242 = vmatpush.bf16.msrb.mxu0 %v643_v9 }
  0x37   :  { %266 = vmatpush.bf16.msrb.mxu1 %v643_v9  ;;  %288 = vmatpush.bf16.msrb.mxu2 %v643_v9 }
  0x38   :  { %312 = vmatpush.bf16.msrb.mxu3 %v643_v9 }
  0x3a   :  { %243 = vmatpush.bf16.msrb.mxu0 %v554_v11 }
  0x3b   :  { %267 = vmatpush.bf16.msrb.mxu1 %v554_v11  ;;  %289 = vmatpush.bf16.msrb.mxu2 %v554_v11 }
  0x3c   :  { %313 = vmatpush.bf16.msrb.mxu3 %v554_v11 }
  0x3e   :  { %244 = vmatpush.bf16.msrb.mxu0 %v553_v13 }
  0x3f   :  { %268 = vmatpush.bf16.msrb.mxu1 %v553_v13  ;;  %290 = vmatpush.bf16.msrb.mxu2 %v553_v13 }
  0x40   :  { %314 = vmatpush.bf16.msrb.mxu3 %v553_v13 }
  0x42   :  { %245 = vmatpush.bf16.msrb.mxu0 %v552_v15 }
  0x43   :  { %269 = vmatpush.bf16.msrb.mxu1 %v552_v15  ;;  %291 = vmatpush.bf16.msrb.mxu2 %v552_v15 }
  0x44   :  { %315 = vmatpush.bf16.msrb.mxu3 %v552_v15 }
  0x46   :  { %330 = vmatpush.bf16.msra.mxu0 %v625_v1 }
  0x4a   :  { %331 = vmatpush.bf16.msra.mxu0 %v628_v3 }
  0x4e   :  { %332 = vmatpush.bf16.msra.mxu0 %v633_v5 }
  0x52   :  { %333 = vmatpush.bf16.msra.mxu0 %v638_v7  ;;  %v567_v7 = vld [vmem:[#allocation2 + $0xb8] sm:$0xff] }
  0x53   :  { %429 = vmatpush.bf16.msra.mxu1 %v567_v7 }
  0x56   :  { %334 = vmatpush.bf16.msra.mxu0 %v643_v9  ;;  %v565_v9 = vld [vmem:[#allocation2 + $0xa8] sm:$0xff] }
  0x57   :  { %430 = vmatpush.bf16.msra.mxu1 %v566_v8 }
  0x5a   :  { %335 = vmatpush.bf16.msra.mxu0 %v554_v11  ;;  %v563_v11 = vld [vmem:[#allocation2 + $0x98] sm:$0xff] }
  0x5b   :  { %431 = vmatpush.bf16.msra.mxu1 %v565_v9 }
  0x5e   :  { %336 = vmatpush.bf16.msra.mxu0 %v553_v13 }
  0x5f   :  { %432 = vmatpush.bf16.msra.mxu1 %v564_v10 }
  0x62   :  { %337 = vmatpush.bf16.msra.mxu0 %v552_v15 }
  0x63   :  { %433 = vmatpush.bf16.msra.mxu1 %v563_v11 }
  0x67   :  { %434 = vmatpush.bf16.msra.mxu1 %v562_v12 }
  0xa2   :  { %v124_v21 = vpop.f32.mrf.mxu0 }
  0xa3   :  { %v186_v22 = vpop.f32.mrf.mxu1  ;;  %v684_v23 = vadd.f32 %v571_v20, %v124_v21  ;;  %v561_v21 = vld [vmem:[#allocation2 + $0x88] sm:$0xff] }
  0xa4   :  { %435 = vmatpush.bf16.msra.mxu1 %v561_v21 }
  0xa5   :  { %v190_v24 = vadd.f32 %v186_v22, %v684_v23  ;;  %v560_v22 = vld [vmem:[#allocation2 + $0x80] sm:$0xff] }
  0xa7   :  { %v191_v25 = vmax.f32 %v190_v24, 0.0 }
  0xa8   :  { %436 = vmatpush.bf16.msra.mxu1 %v560_v22 }
  0xa9   :  { %v192_v26 = vpack.c.bf16 %v191_v25, %v191_v25 }
  0xaa   :  { %v126_v27 = vpop.f32.mrf.mxu0 }
  0xab   :  { %v188_v28 = vpop.f32.mrf.mxu1  ;;  %201 = vmatmul.bf16.vlgmr.msra.gmra.mxu2 %v192_v26 }
 0x12e   :  { %v202_v29 = vpop.f32.mrf.mxu2 }
 0x12f   :  { %v207_v30 = vrot.slane %v202_v29, 7 }
 0x131   :  { %v209_v31 = vadd.f32 %v207_v30, %v684_v23 }
 0x133   :  { %v210_v32 = vmax.f32 %v209_v31, 0.0  ;;  %v572_v31 = vld [vmem:[%s702_s2 + $0x10] ss:$0 sm:$0xff] }
 0x135   :  { %v211_v33 = vpack.c.bf16 %v210_v32, %v210_v32  ;;  %v349_v40 = vsel %vm348_vm0, %v191_v25, %v210_v32 }
 0x136   :  { %v204_v34 = vpop.f32.mrf.mxu2 }
 0x137   :  { %v213_v35 = vshrl.u32 %v211_v33, 16 }
 0x139   :  { %224 = vmatmul.bf16.vlgmr.msra.gmra.mxu3 %v213_v35 }
 0x1bc   :  { %v225_v36 = vpop.f32.mrf.mxu3 }
 0x1bd   :  { %v230_v37 = vrot.slane %v225_v36, 6 }
 0x1bf   :  { %v232_v38 = vadd.f32 %v230_v37, %v684_v23 }
 0x1c1   :  { %v233_v39 = vmax.f32 %v232_v38, 0.0 }
 0x1c3   :  { %v351_v41 = vsel %vm350_vm1, %v349_v40, %v233_v39  ;;  %v234_v42 = vpack.c.bf16 %v233_v39, %v233_v39 }
 0x1c4   :  { %v227_v43 = vpop.f32.mrf.mxu3 }
 0x1c5   :  { %v236_v44 = vrot.slane %v234_v42, 1 }
 0x1c7   :  { %246 = vmatmul.bf16.vlgmr.msrb.gmra.mxu0 %v236_v44 }
 0x244   :  { %v247_v45 = vpop.f32.mrf.mxu0 }
 0x245   :  { %v252_v46 = vrot.slane %v247_v45, 5 }
 0x247   :  { %v254_v47 = vadd.f32 %v252_v46, %v684_v23 }
 0x249   :  { %v255_v48 = vmax.f32 %v254_v47, 0.0 }
 0x24b   :  { %v353_v49 = vsel %vm352_vm2, %v351_v41, %v255_v48  ;;  %v256_v50 = vpack.c.bf16 %v255_v48, %v255_v48 }
 0x24c   :  { %v249_v51 = vpop.f32.mrf.mxu0 }
 0x24d   :  { %v258_v52 = vshrl.u32 %v256_v50, 16 }
 0x24f   :  { %v260_v53 = vrot.slane %v258_v52, 1 }
 0x251   :  { %270 = vmatmul.bf16.vlgmr.msrb.gmra.mxu1 %v260_v53 }
 0x2ce   :  { %v271_v54 = vpop.f32.mrf.mxu1 }
 0x2cf   :  { %v276_v55 = vrot.slane %v271_v54, 4 }
 0x2d1   :  { %v278_v56 = vadd.f32 %v276_v55, %v684_v23 }
 0x2d3   :  { %v279_v57 = vmax.f32 %v278_v56, 0.0 }
 0x2d5   :  { %v355_v58 = vsel %vm354_vm3, %v353_v49, %v279_v57  ;;  %v280_v59 = vpack.c.bf16 %v279_v57, %v279_v57 }
 0x2d6   :  { %v273_v60 = vpop.f32.mrf.mxu1 }
 0x2d7   :  { %v282_v61 = vrot.slane %v280_v59, 2 }
 0x2d9   :  { %292 = vmatmul.bf16.vlgmr.msrb.gmra.mxu2 %v282_v61 }
 0x35c   :  { %v293_v62 = vpop.f32.mrf.mxu2 }
 0x35d   :  { %v298_v63 = vrot.slane %v293_v62, 3 }
 0x35f   :  { %v300_v0 = vadd.f32 %v298_v63, %v684_v23 }
 0x361   :  { %v301_v1 = vmax.f32 %v300_v0, 0.0 }
 0x363   :  { %v357_v2 = vsel %vm356_vm4, %v355_v58, %v301_v1  ;;  %v302_v3 = vpack.c.bf16 %v301_v1, %v301_v1 }
 0x364   :  { %v295_v4 = vpop.f32.mrf.mxu2 }
 0x365   :  { %v304_v5 = vshrl.u32 %v302_v3, 16 }
 0x367   :  { %v306_v6 = vrot.slane %v304_v5, 2 }
 0x369   :  { %316 = vmatmul.bf16.vlgmr.msrb.gmra.mxu3 %v306_v6 }
 0x3ec   :  { %v317_v13 = vpop.f32.mrf.mxu3 }
 0x3ed   :  { %v322_v14 = vrot.slane %v317_v13, 2 }
 0x3ef   :  { %v324_v15 = vadd.f32 %v322_v14, %v684_v23 }
 0x3f1   :  { %v325_v16 = vmax.f32 %v324_v15, 0.0 }
 0x3f3   :  { %v326_v17 = vpack.c.bf16 %v325_v16, %v325_v16  ;;  %v359_v18 = vsel %vm358_vm5, %v357_v2, %v325_v16 }
 0x3f4   :  { %v319_v19 = vpop.f32.mrf.mxu3 }
 0x3f5   :  { %v328_v20 = vrot.slane %v326_v17, 3 }
 0x3f7   :  { %338 = vmatmul.bf16.vlgmr.msra.gmra.mxu0 %v328_v20 }
 0x474   :  { %v339_v24 = vpop.f32.mrf.mxu0 }
 0x475   :  { %v344_v25 = vrot.slane %v339_v24, 1 }
 0x477   :  { %v346_v26 = vadd.f32 %v344_v25, %v684_v23 }
 0x479   :  { %v347_v27 = vmax.f32 %v346_v26, 0.0 }
 0x47b   :  { %v361_v28 = vsel %vm360_vm6, %v359_v18, %v347_v27 }
 0x47c   :  { %v341_v29 = vpop.f32.mrf.mxu0  ;;  %v379_v30 = vpack.c.bf16 %v361_v28, %v361_v28 }
 0x47e   :  { %437 = vmatmul.bf16.vlgmr.msra.gmra.mxu1 %v379_v30 }
 0x4fb   :  { %v438_v32 = vpop.f32.mrf.mxu1 }
 0x4fc   :  { %v439_v33 = vadd.f32 %v572_v31, %v438_v32 }
 0x4fe   :  { %442 = vst [vmem:[%s703_s3] sm:$0xff] %v439_v33 }
 0x503   :  { %v440_v34 = vpop.f32.mrf.mxu1 }
 0x504   :  { %447 = vsyncpa [#allocation3], 1 }

</bundles_post_ra>
